<compile_context>
chip_gen: v7x
topology: tpu7x:2x2x1
jax: 0.10.0
libtpu: 0.0.40
codegen_flags: <defaults>
</compile_context>

<pallas_src>
import functools

import jax
import jax.numpy as jnp
from jax.experimental import pallas as pl
from jax.experimental.pallas import tpu as pltpu


def _round_up(x, m):
    return ((x + m - 1) // m) * m


def _tpu_info():
    """(vmem_capacity_bytes, is_v7x) with conservative fallbacks."""
    is_v7 = False
    try:
        kind = jax.devices()[0].device_kind.lower()
        is_v7 = "v7" in kind
    except Exception:
        pass
    vmem = None
    try:
        vmem = int(pltpu.get_tpu_info().vmem_capacity_bytes)
    except Exception:
        vmem = None
    if not vmem or vmem <= 0:
        vmem = (64 << 20) if is_v7 else (128 << 20)
    return vmem, is_v7


def _pick_hidden_tile(hidden_p, max_tk):
    """Largest lane-aligned tile <= max_tk that divides hidden_p.

    Prefers 256 multiples (v6e/v7x MXUs are 2x256x256; a 128-wide pass leaves
    half the MXU idle), falls back to 128 multiples (128 always divides the
    padded hidden, and is all a v5e 128x128 MXU needs).
    """
    if hidden_p <= max_tk:
        return hidden_p
    for step in (256, 128):
        c = (max_tk // step) * step
        while c >= step:
            if hidden_p % c == 0:
                return c
            c -= step
    return 128


def _ffn_kernel_resident(x_ref, w1_ref, b1_ref, w2_ref, b2_ref, o_ref):
    # Weights fully VMEM-resident: single pass, no accumulator scratch needed.
    h = jnp.dot(x_ref[...], w1_ref[...], preferred_element_type=jnp.float32)
    h = jnp.maximum(h + b1_ref[...].astype(jnp.float32), 0.0)  # ReLU
    # TODO(synk): training-mode dropout (pltpu.prng_seed + prng_random_bits mask);
    # eval-mode nn.Dropout is the identity, which is what we reproduce here.
    out = jnp.dot(h.astype(w2_ref.dtype), w2_ref[...],
                  preferred_element_type=jnp.float32)
    o_ref[...] = (out + b2_ref[...].astype(jnp.float32)).astype(o_ref.dtype)


def _ffn_kernel_tiled(x_ref, w1_ref, b1_ref, w2_ref, b2_ref, o_ref, acc_ref):
    # hidden dim streamed on grid axis 1 ("arbitrary"); f32 accumulator scratch.
    k = pl.program_id(1)

    @pl.when(k == 0)
    def _init():
        acc_ref[...] = jnp.zeros_like(acc_ref)

    h = jnp.dot(x_ref[...], w1_ref[...], preferred_element_type=jnp.float32)
    h = jnp.maximum(h + b1_ref[...].astype(jnp.float32), 0.0)  # ReLU
    # TODO(synk): training-mode dropout; identity in eval mode.
    acc_ref[...] += jnp.dot(h.astype(w2_ref.dtype), w2_ref[...],
                            preferred_element_type=jnp.float32)

    @pl.when(k == pl.num_programs(1) - 1)
    def _finalize():
        o_ref[...] = (acc_ref[...] + b2_ref[...].astype(jnp.float32)).astype(o_ref.dtype)


@functools.partial(jax.jit, static_argnames=("block_m", "block_h", "compute_dtype"))
def ffn_forward(x, w1, b1, w2, b2, *, block_m=None, block_h=512, compute_dtype=None):
    """Fused Linear -> ReLU -> (eval) Dropout -> Linear on TPU via Pallas."""
    orig_lead = x.shape[:-1]
    d_in = x.shape[-1]
    hidden = w1.shape[1]
    d_out = w2.shape[1]
    out_dtype = x.dtype

    if compute_dtype is not None:
        # Hot-path contract: bf16 operands keep the MXU at full rate on all
        # generations; accumulation stays f32 inside the kernel.
        x = x.astype(compute_dtype)
        w1 = w1.astype(compute_dtype)
        w2 = w2.astype(compute_dtype)

    x2d = x.reshape(-1, d_in)
    m = x2d.shape[0]

    vmem_cap, is_v7x = _tpu_info()
    budget = int(0.85 * vmem_cap)     # planning budget (leaves Mosaic scratch room)
    limit_cap = int(0.90 * vmem_cap)  # hard ceiling for vmem_limit_bytes

    xbytes = jnp.dtype(x.dtype).itemsize
    wbytes = jnp.dtype(w1.dtype).itemsize
    obytes = jnp.dtype(out_dtype).itemsize

    # ---- M tiling (generation-aware): 512 on 128 MiB parts, 256 on v7x (64 MiB).
    if block_m is None:
        block_m = 256 if is_v7x else 512
    tm = min(block_m, _round_up(m, 8))
    if is_v7x and m > 8 and pl.cdiv(m, tm) < 2:
        # >= 2 M blocks only pays off where a second TensorCore exists (v7x).
        tm = _round_up(pl.cdiv(m, 2), 8)
    m_blocks = pl.cdiv(m, tm)

    # ---- Lane-dense output: pad d_out to a 128 multiple (masked partial stores
    # are far slower); slice back after the kernel. Zero padding is exact.
    d_out_p = _round_up(d_out, 128)
    if d_out_p != d_out:
        w2 = jnp.pad(w2, ((0, 0), (0, d_out_p - d_out)))
        b2 = jnp.pad(b2, ((0, d_out_p - d_out),))

    # ---- Weight residency decision: keep W1/W2 fully VMEM-resident
    # (Buffered(1), weights fetched from HBM exactly once) whenever they fit.
    def resident_footprint(tm_):
        return (2 * tm_ * d_in * xbytes          # x tile (double buffered)
                + d_in * hidden * wbytes         # W1 (resident, single buffer)
                + hidden * wbytes                # b1
                + hidden * d_out_p * wbytes      # W2
                + d_out_p * wbytes               # b2
                + 2 * tm_ * d_out_p * obytes)    # out tile (double buffered)

    resident = resident_footprint(tm) <= budget

    if resident:
        hidden_p = hidden
        tk = hidden
        k_blocks = 1
        footprint = resident_footprint(tm)
    else:
        # Stream the hidden dim. Pad it to a 128 multiple so a lane-aligned tile
        # always divides it exactly (zero padding is mathematically exact).
        hidden_p = _round_up(hidden, 128)
        tk = _pick_hidden_tile(hidden_p, block_h)

        def tiled_footprint(tm_, tk_):
            return (2 * tm_ * d_in * xbytes
                    + 3 * d_in * tk_ * wbytes     # W1 slice, Buffered(3)
                    + 3 * tk_ * wbytes            # b1 slice, Buffered(3)
                    + 3 * tk_ * d_out_p * wbytes  # W2 slice, Buffered(3)
                    + d_out_p * wbytes            # b2 (resident)
                    + 2 * tm_ * d_out_p * obytes  # out tile
                    + tm_ * d_out_p * 4)          # f32 accumulator scratch

        while tiled_footprint(tm, tk) > budget and tk > 128:
            tk = _pick_hidden_tile(hidden_p, tk - 128)
        while tiled_footprint(tm, tk) > budget and tm > 64:
            tm = max(64, _round_up(tm // 2, 8))
            m_blocks = pl.cdiv(m, tm)
        k_blocks = hidden_p // tk
        footprint = tiled_footprint(tm, tk)

        if hidden_p != hidden:
            w1 = jnp.pad(w1, ((0, 0), (0, hidden_p - hidden)))
            b1 = jnp.pad(b1, ((0, hidden_p - hidden),))
            w2 = jnp.pad(w2, ((0, hidden_p - hidden), (0, 0)))

    b1_2d = b1.reshape(1, hidden_p)
    b2_2d = b2.reshape(1, d_out_p)

    # ---- VMEM limit: footprint + headroom, capped near physical capacity
    # (100 MiB-style caps overflow v7x's 64 MiB per-TC VMEM).
    vmem_limit = footprint + (8 << 20)
    if vmem_limit > limit_cap:
        vmem_limit = max(limit_cap, footprint + (2 << 20))
    vmem_limit = int(max(vmem_limit, 32 << 20))

    # ---- Megacore: only CORE_PARALLEL actually shards the grid across the two
    # v7x TensorCores; plain PARALLEL elsewhere / for odd block counts.
    if is_v7x and m_blocks >= 2 and m_blocks % 2 == 0:
        m_sem = pltpu.CORE_PARALLEL
    else:
        m_sem = pltpu.PARALLEL

    # ---- Cost estimate reflecting actual DMA traffic (weights re-streamed per
    # M block only when the hidden dim is tiled).
    weight_stream = 1 if k_blocks == 1 else m_blocks
    cost = pl.CostEstimate(
        flops=2 * m * hidden_p * (d_in + d_out_p),
        transcendentals=0,
        bytes_accessed=int(
            x2d.size * xbytes
            + weight_stream * (w1.size * jnp.dtype(w1.dtype).itemsize
                               + b1_2d.size * jnp.dtype(b1_2d.dtype).itemsize
                               + w2.size * jnp.dtype(w2.dtype).itemsize)
            + b2_2d.size * jnp.dtype(b2_2d.dtype).itemsize
            + m * d_out_p * obytes),
    )

    if k_blocks == 1:
        # Fully-resident weights: 1-D grid over M, no accumulator scratch.
        def _res(shape):
            return pl.BlockSpec(shape, lambda i: (0, 0), pipeline_mode=pl.Buffered(1))

        grid_spec = pltpu.PrefetchScalarGridSpec(
            num_scalar_prefetch=0,
            grid=(m_blocks,),
            in_specs=[
                pl.BlockSpec((tm, d_in), lambda i: (i, 0)),
                _res((d_in, hidden_p)),
                _res((1, hidden_p)),
                _res((hidden_p, d_out_p)),
                _res((1, d_out_p)),
            ],
            out_specs=pl.BlockSpec((tm, d_out_p), lambda i: (i, 0)),
        )
        kernel = _ffn_kernel_resident
        dim_sem = (m_sem,)
    else:
        # Streamed hidden dim: 2-D grid (M blocks, hidden blocks).
        def _stream(shape, imap):
            return pl.BlockSpec(shape, imap, pipeline_mode=pl.Buffered(3))

        grid_spec = pltpu.PrefetchScalarGridSpec(
            num_scalar_prefetch=0,
            grid=(m_blocks, k_blocks),
            in_specs=[
                pl.BlockSpec((tm, d_in), lambda i, k: (i, 0)),
                _stream((d_in, tk), lambda i, k: (0, k)),
                _stream((1, tk), lambda i, k: (0, k)),
                _stream((tk, d_out_p), lambda i, k: (k, 0)),
                pl.BlockSpec((1, d_out_p), lambda i, k: (0, 0),
                             pipeline_mode=pl.Buffered(1)),
            ],
            out_specs=pl.BlockSpec((tm, d_out_p), lambda i, k: (i, 0)),
            scratch_shapes=[pltpu.VMEM((tm, d_out_p), jnp.float32)],
        )
        kernel = _ffn_kernel_tiled
        dim_sem = (m_sem, pltpu.ARBITRARY)

    out = pl.pallas_call(
        kernel,
        out_shape=jax.ShapeDtypeStruct((m, d_out_p), out_dtype),
        grid_spec=grid_spec,
        compiler_params=pltpu.CompilerParams(
            dimension_semantics=dim_sem,
            vmem_limit_bytes=vmem_limit,
        ),
        cost_estimate=cost,
    )(x2d, w1, b1_2d, w2, b2_2d)

    if d_out_p != d_out:
        out = out[:, :d_out]
    return out.reshape(orig_lead + (d_out,))


def init_params(key, input_dim, hidden_dim, output_dim, dtype=jnp.float32):
    """Deterministic init mirroring nn.Linear's U(-1/sqrt(fan_in), 1/sqrt(fan_in))."""
    k1, k2, k3, k4 = jax.random.split(key, 4)
    bound1 = 1.0 / (input_dim ** 0.5)
    bound2 = 1.0 / (hidden_dim ** 0.5)
    # Stored as (in, out) = transposed PyTorch (out, in) layout.
    w1 = jax.random.uniform(k1, (input_dim, hidden_dim), dtype, -bound1, bound1)
    b1 = jax.random.uniform(k2, (hidden_dim,), dtype, -bound1, bound1)
    w2 = jax.random.uniform(k3, (hidden_dim, output_dim), dtype, -bound2, bound2)
    b2 = jax.random.uniform(k4, (output_dim,), dtype, -bound2, bound2)
    return w1, b1, w2, b2


def _reference(x, w1, b1, w2, b2):
    h = jnp.maximum(x @ w1 + b1, 0.0)  # nn.ReLU
    return h @ w2 + b2                 # nn.Dropout is identity in eval mode


if __name__ == "__main__":
    input_dim, hidden_dim, output_dim, dropout = 32, 64, 32, 0.1
    batch, seq = 2, 8

    key = jax.random.PRNGKey(0)
    kx, kp = jax.random.split(key)
    x = jax.random.normal(kx, (batch, seq, input_dim), dtype=jnp.float32)
    w1, b1, w2, b2 = init_params(kp, input_dim, hidden_dim, output_dim)

    y = ffn_forward(x, w1, b1, w2, b2)
    y = jax.block_until_ready(y)

    y_ref = _reference(x, w1, b1, w2, b2)
    assert y.shape == (batch, seq, output_dim), y.shape
    assert jnp.allclose(y, y_ref, rtol=1e-4, atol=1e-4), "mismatch vs reference"

    print("KERNEL_OK")
</pallas_src>

<mosaic_0001>
module attributes {stable_mosaic.version = 11 : i64} {
  func.func @_ffn_kernel_resident(%arg0: i32, %arg1: memref<16x32xf32, #tpu.memory_space<vmem>>, %arg2: memref<32x64xf32, #tpu.memory_space<vmem>>, %arg3: memref<1x64xf32, #tpu.memory_space<vmem>>, %arg4: memref<64x128xf32, #tpu.memory_space<vmem>>, %arg5: memref<1x128xf32, #tpu.memory_space<vmem>>, %arg6: memref<16x128xf32, #tpu.memory_space<vmem>>) attributes {dimension_semantics = [#tpu.dimension_semantics<parallel>], iteration_bounds = array<i64: 1>, scalar_prefetch = 0 : i64, scratch_operands = 0 : i64, tpu.core_type = #tpu.core_type<tc>, window_params = [{transform_indices = @transform_0, window_bounds = array<i64: 16, 32>}, {pipeline_mode = #tpu.pipeline_mode<synchronous>, transform_indices = @transform_1, window_bounds = array<i64: 32, 64>}, {pipeline_mode = #tpu.pipeline_mode<synchronous>, transform_indices = @transform_2, window_bounds = array<i64: 1, 64>}, {pipeline_mode = #tpu.pipeline_mode<synchronous>, transform_indices = @transform_3, window_bounds = array<i64: 64, 128>}, {pipeline_mode = #tpu.pipeline_mode<synchronous>, transform_indices = @transform_4, window_bounds = array<i64: 1, 128>}, {transform_indices = @transform_5, window_bounds = array<i64: 16, 128>}]} {
    %c0 = arith.constant 0 : index
    %c0_0 = arith.constant 0 : index
    %0 = vector.load %arg1[%c0, %c0_0] : memref<16x32xf32, #tpu.memory_space<vmem>>, vector<16x32xf32>
    %c0_1 = arith.constant 0 : index
    %c0_2 = arith.constant 0 : index
    %1 = vector.load %arg2[%c0_1, %c0_2] : memref<32x64xf32, #tpu.memory_space<vmem>>, vector<32x64xf32>
    %cst = arith.constant dense<0.000000e+00> : vector<16x64xf32>
    %2 = tpu.matmul %0, %1, %cst {dimension_numbers = #tpu.dot_dimension_numbers<[1], [0], [0], [1], [0, 0, 1, 1], [], []>} : vector<16x32xf32>, vector<32x64xf32>, vector<16x64xf32> -> vector<16x64xf32>
    %c0_3 = arith.constant 0 : index
    %c0_4 = arith.constant 0 : index
    %3 = vector.load %arg3[%c0_3, %c0_4] : memref<1x64xf32, #tpu.memory_space<vmem>>, vector<1x64xf32>
    %4 = vector.broadcast %3 : vector<1x64xf32> to vector<16x64xf32>
    %5 = arith.addf %2, %4 : vector<16x64xf32>
    %cst_5 = arith.constant 0.000000e+00 : f32
    %6 = vector.broadcast %cst_5 : f32 to vector<16x64xf32>
    %7 = arith.maximumf %5, %6 : vector<16x64xf32>
    %c0_6 = arith.constant 0 : index
    %c0_7 = arith.constant 0 : index
    %8 = vector.load %arg4[%c0_6, %c0_7] : memref<64x128xf32, #tpu.memory_space<vmem>>, vector<64x128xf32>
    %cst_8 = arith.constant dense<0.000000e+00> : vector<16x128xf32>
    %9 = tpu.matmul %7, %8, %cst_8 {dimension_numbers = #tpu.dot_dimension_numbers<[1], [0], [0], [1], [0, 0, 1, 1], [], []>} : vector<16x64xf32>, vector<64x128xf32>, vector<16x128xf32> -> vector<16x128xf32>
    %c0_9 = arith.constant 0 : index
    %c0_10 = arith.constant 0 : index
    %10 = vector.load %arg5[%c0_9, %c0_10] : memref<1x128xf32, #tpu.memory_space<vmem>>, vector<1x128xf32>
    %11 = vector.broadcast %10 : vector<1x128xf32> to vector<16x128xf32>
    %12 = arith.addf %9, %11 : vector<16x128xf32>
    %c0_11 = arith.constant 0 : index
    %c0_12 = arith.constant 0 : index
    %13 = vector.load %arg6[%c0_11, %c0_12] : memref<16x128xf32, #tpu.memory_space<vmem>>, vector<16x128xf32>
    tpu.vector_store %arg6[%c0_11, %c0_12], %12 {strides = array<i32>} : memref<16x128xf32, #tpu.memory_space<vmem>>, vector<16x128xf32>,
    return
  }
  func.func @transform_0(%arg0: i32) -> (i32, i32) {
    %c0_i32 = arith.constant 0 : i32
    %c0_i32_0 = arith.constant 0 : i32
    return %arg0, %c0_i32 : i32, i32
  }
  func.func @transform_1(%arg0: i32) -> (i32, i32) {
    %c0_i32 = arith.constant 0 : i32
    %c0_i32_0 = arith.constant 0 : i32
    %c0_i32_1 = arith.constant 0 : i32
    return %c0_i32, %c0_i32_0 : i32, i32
  }
  func.func @transform_2(%arg0: i32) -> (i32, i32) {
    %c0_i32 = arith.constant 0 : i32
    %c0_i32_0 = arith.constant 0 : i32
    %c0_i32_1 = arith.constant 0 : i32
    return %c0_i32, %c0_i32_0 : i32, i32
  }
  func.func @transform_3(%arg0: i32) -> (i32, i32) {
    %c0_i32 = arith.constant 0 : i32
    %c0_i32_0 = arith.constant 0 : i32
    %c0_i32_1 = arith.constant 0 : i32
    return %c0_i32, %c0_i32_0 : i32, i32
  }
  func.func @transform_4(%arg0: i32) -> (i32, i32) {
    %c0_i32 = arith.constant 0 : i32
    %c0_i32_0 = arith.constant 0 : i32
    %c0_i32_1 = arith.constant 0 : i32
    return %c0_i32, %c0_i32_0 : i32, i32
  }
  func.func @transform_5(%arg0: i32) -> (i32, i32) {
    %c0_i32 = arith.constant 0 : i32
    %c0_i32_0 = arith.constant 0 : i32
    return %arg0, %c0_i32 : i32, i32
  }
}

</mosaic_0001>

<bundles_post_ra>
// kernel: ffn_forward.1
= control target key start
LH: loop header
LB: loop body
LE: loop exit
PB: predicated region body
PF: predicated region fallthrough
CT: control target
= control target key end

     0   :  { %vm33_vm0 = vcmask 261120   ;;  %vm132_vm1 = vcmask 523264   ;;  %s382_s1 = inlined_call_operand.vmem [shape: f32[32,64], index: 1, kind: input, shape index: {}]   ;;  %s383_s0 = inlined_call_operand.vmem [shape: f32[16,32], index: 0, kind: input, shape index: {}]   ;;  %s384_s3 = inlined_call_operand.vmem [shape: f32[64,128], index: 3, kind: input, shape index: {}]   ;;  %s385_s2 = inlined_call_operand.vmem [shape: f32[1,64], index: 2, kind: input, shape index: {}]   ;;  %s386_s4 = inlined_call_operand.vmem [shape: f32[1,128], index: 4, kind: input, shape index: {}]   ;;  %s387_s5 = inlined_call_operand.vmem [shape: f32[16,128], index: 5, kind: output, shape index: {}]  }
   0x1   :  { %v22_v0 = vld [vmem:[%s382_s1] sm:$0xff]  ;;  %v23_v1 = vld [vmem:[%s382_s1 + $0x8] sm:$0xff]  ;;  %v24_v2 = vld [vmem:[%s382_s1 + $0x10] sm:$0xff] }
   0x2   :  { %v272_v3 = vpack.c.bf16 %v23_v1, %v22_v0  ;;  %v25_v4 = vld [vmem:[%s382_s1 + $0x18] sm:$0xff]  ;;  %v20_v5 = vld [vmem:[%s383_s0] sm:$0xff]  ;;  %v118_v8 = vld [vmem:[%s384_s3 + $0x8] sm:$0xff] }
   0x3   :  { %v276_v6 = vpack.c.bf16 %v25_v4, %v24_v2  ;;  %250 = vmatprep.mubr.msk.f32.mxu0 %vm33_vm0, %v20_v5  ;;  %v117_v7 = vld [vmem:[%s384_s3] sm:$0xff]  ;;  %v119_v9 = vld [vmem:[%s384_s3 + $0x10] sm:$0xff]  ;;  %v120_v11 = vld [vmem:[%s384_s3 + $0x18] sm:$0xff] }
   0x4   :  { %273 = vmatprep.subr.bf16.mxu0 %v272_v3  ;;  %v280_v10 = vpack.c.bf16 %v118_v8, %v117_v7  ;;  %v284_v12 = vpack.c.bf16 %v120_v11, %v119_v9  ;;  %v121_v13 = vld [vmem:[%s384_s3 + $0x20] sm:$0xff]  ;;  %v122_v14 = vld [vmem:[%s384_s3 + $0x28] sm:$0xff]  ;;  %v123_v17 = vld [vmem:[%s384_s3 + $0x30] sm:$0xff] }
   0x5   :  { %275 = vmatpush3.bf16.msra.mxu0 %v272_v3  ;;  %v288_v15 = vpack.c.bf16 %v122_v14, %v121_v13  ;;  %v21_v16 = vld [vmem:[%s383_s0 + $0x8] sm:$0xff]  ;;  %v124_v18 = vld [vmem:[%s384_s3 + $0x38] sm:$0xff]  ;;  %v220_v20 = vld [vmem:[%s385_s2] ss:$0 sm:$0xff] }
   0x6   :  { %277 = vmatprep.subr.bf16.mxu0 %v276_v6  ;;  %281 = vmatprep.subr.bf16.mxu1 %v280_v10  ;;  %v292_v19 = vpack.c.bf16 %v124_v18, %v123_v17  ;;  %v223_v27 = vld [vmem:[%s386_s4] ss:$0 sm:$0xff] }
   0x7   :  { %283 = vmatpush3.bf16.msra.mxu1 %v280_v10 }
   0x8   :  { %285 = vmatprep.subr.bf16.mxu1 %v284_v12 }
   0x9   :  { %279 = vmatpush3.bf16.msra.mxu0 %v276_v6 }
   0xb   :  { %287 = vmatpush3.bf16.msra.mxu1 %v284_v12 }
   0xc   :  { %251 = vmatmul.mubr.msk.f32.vlgmr.msra.gmra.mrb[0].mxu0 %vm33_vm0, %v21_v16  ;;  %289 = vmatprep.subr.bf16.mxu1 %v288_v15 }
   0xf   :  { %291 = vmatpush3.bf16.msra.mxu1 %v288_v15 }
  0x10   :  { %293 = vmatprep.subr.bf16.mxu1 %v292_v19 }
  0x13   :  { %295 = vmatpush3.bf16.msra.mxu1 %v292_v19 }
  0xdf   :  { %v252_v21 = vpop.f32.mrb[0].mxu0 }
  0xe0   :  { %v112_v22 = vadd.f32 %v252_v21, %v220_v20  ;;  %v106_v23 = vpop.f32.mrb[1].mxu0 }
  0xe1   :  { %v107_v24 = vadd.f32 %v220_v20, %v106_v23 }
  0xe2   :  { %v116_v26 = vmax.f32 %v112_v22, 0.0 }
  0xe3   :  { %v115_v25 = vmax.f32 %v107_v24, 0.0 }
  0xe5   :  { %269 = vmatprep.mubr.msk.f32.mxu1 %vm132_vm1, %v115_v25 }
  0xe6   :  { %270 = vmatmul.mubr.msk.f32.vlgmr.msra.gmra.mrb[0].mxu1 %vm132_vm1, %v116_v26 }
 0x1b9   :  { %v271_v28 = vpop.f32.mrb[0].mxu1 }
 0x1ba   :  { %v211_v29 = vadd.f32 %v271_v28, %v223_v27  ;;  %v205_v30 = vpop.f32.mrb[1].mxu1 }
 0x1bb   :  { %v206_v31 = vadd.f32 %v223_v27, %v205_v30 }
 0x1bc   :  { %215 = vst [vmem:[%s387_s5 + $0x8] sm:$0xff] %v211_v29 }
 0x1bd   :  { %214 = vst [vmem:[%s387_s5] sm:$0xff] %v206_v31 }

</bundles_post_ra>
